<compile_context>
chip_gen: v6e
topology: v6e:2x2x1
jax: 0.10.0
libtpu: 0.0.40
codegen_flags: <defaults>
</compile_context>

<pallas_src>
import jax
import jax.numpy as jnp
from jax.experimental import pallas as pl
from jax.experimental.pallas import tpu as pltpu


# ----------------------------------------------------------------------------
# Pallas kernel: y = sum(x * w) + b   (== x @ W.T + b for a 1-output Linear)
# ----------------------------------------------------------------------------
def _regressor_head_kernel(x_ref, w_ref, b_ref, out_ref):
    # x_ref, w_ref : (rows, cols) native dtype in VMEM (rows*cols == d_model)
    # b_ref        : (1,) f32 in SMEM
    # out_ref      : (1,) f32 in SMEM
    x = x_ref[...].astype(jnp.float32)          # in-kernel upcast (halves DMA bytes)
    w = w_ref[...].astype(jnp.float32)
    prod = x * w                                # VPU elementwise multiply
    # Sublane-direction sum first (VPU adds across sublanes/vregs), then one
    # 128-lane cross-lane reduce (XLU).  For the (1, D) layout the axis-0 sum
    # is a no-op.
    row = jnp.sum(prod, axis=0, keepdims=True)  # (1, cols)
    out_ref[0] = jnp.sum(row) + b_ref[0]        # XLU reduce + scalar add, scalar store


def _dense_layout(flat, d_model):
    """Sublane-dense (d_model//128, 128) layout when it pays off, else (1, D)."""
    if d_model % 128 == 0 and d_model >= 1024:
        return flat.reshape(d_model // 128, 128)
    return flat.reshape(1, d_model)


def regressor_head_pallas(x, weight, bias):
    """Pallas equivalent of RegressorHead.forward.

    x:      (d_model,) or (1, d_model), any float dtype (kept native)
    weight: (1, d_model)  -- PyTorch nn.Linear(d_model, 1).weight layout
    bias:   (1,)
    returns shape (1,) float32 (matches .view((1,)) of an f32 Linear).
    """
    x = jnp.asarray(x)
    weight = jnp.asarray(weight)
    d_model = int(x.size)
    assert int(weight.size) == d_model, "weight must be (1, d_model)"

    x2 = _dense_layout(x.reshape(-1), d_model)        # native dtype, no upcast
    w2 = _dense_layout(weight.reshape(-1), d_model)   # native dtype, no upcast
    b1 = jnp.asarray(bias, jnp.float32).reshape(1,)   # single scalar -> f32 SMEM
    rows, cols = x2.shape

    bytes_in = (x2.size * x2.dtype.itemsize
                + w2.size * w2.dtype.itemsize
                + b1.size * 4)
    cost = pl.CostEstimate(flops=2 * d_model,
                           transcendentals=0,
                           bytes_accessed=bytes_in + 4)

    return pl.pallas_call(
        _regressor_head_kernel,
        out_shape=jax.ShapeDtypeStruct((1,), jnp.float32),
        in_specs=[
            # Full-array VMEM blocks (full dims waive (8,128) divisibility).
            # Gridless call: default buffering accepted (nothing to pipeline).
            pl.BlockSpec((rows, cols), lambda: (0, 0)),              # x (VMEM, native dtype)
            pl.BlockSpec((rows, cols), lambda: (0, 0)),              # W (VMEM, native dtype)
            pl.BlockSpec(memory_space=pltpu.MemorySpace.SMEM),       # b (SMEM scalar)
        ],
        out_specs=pl.BlockSpec(memory_space=pltpu.MemorySpace.SMEM), # y (SMEM scalar)
        cost_estimate=cost,
    )(x2, w2, b1)


# ----------------------------------------------------------------------------
# Pure-JAX reference (mirrors the PyTorch math) for verification
# ----------------------------------------------------------------------------
def regressor_head_ref(x, weight, bias):
    x2 = jnp.asarray(x, jnp.float32).reshape(1, -1)
    w2 = jnp.asarray(weight, jnp.float32).reshape(1, -1)
    b1 = jnp.asarray(bias, jnp.float32).reshape(1,)
    return (x2 @ w2.T).reshape(1,) + b1


if __name__ == "__main__":
    # Small shapes consistent with the module: d_model=32 (n_cxt unused in forward).
    D_MODEL, N_CXT = 32, 8

    key = jax.random.PRNGKey(0)
    kx, kw, kb = jax.random.split(key, 3)
    x = jax.random.normal(kx, (D_MODEL,), jnp.float32)

    # PyTorch nn.Linear(d_model, 1) default init: U(-1/sqrt(d_model), 1/sqrt(d_model))
    bound = 1.0 / (D_MODEL ** 0.5)
    weight = jax.random.uniform(kw, (1, D_MODEL), jnp.float32, -bound, bound)
    bias = jax.random.uniform(kb, (1,), jnp.float32, -bound, bound)

    # --- f32 path (matches the PyTorch module bit-for-bit semantics) ---------
    out = jax.block_until_ready(regressor_head_pallas(x, weight, bias))
    ref = regressor_head_ref(x, weight, bias)
    assert out.shape == (1,), f"bad output shape {out.shape}"
    assert jnp.allclose(out, ref, atol=1e-5, rtol=1e-5), "f32 mismatch vs reference"

    # --- native-bf16 path (in-kernel upcast, no wrapper convert) -------------
    x_bf16 = x.astype(jnp.bfloat16)
    w_bf16 = weight.astype(jnp.bfloat16)
    out_bf16 = jax.block_until_ready(regressor_head_pallas(x_bf16, w_bf16, bias))
    ref_bf16 = regressor_head_ref(x_bf16, w_bf16, bias)
    assert jnp.allclose(out_bf16, ref_bf16, atol=1e-2, rtol=1e-2), "bf16 mismatch"

    # --- sublane-dense layout path (d_model >= 1024, multiple of 128) --------
    D_BIG = 1024
    kx2, kw2 = jax.random.split(kx)
    xb = jax.random.normal(kx2, (D_BIG,), jnp.bfloat16)
    wb = jax.random.uniform(kw2, (1, D_BIG), jnp.float32,
                            -1.0 / (D_BIG ** 0.5), 1.0 / (D_BIG ** 0.5)).astype(jnp.bfloat16)
    out_big = jax.block_until_ready(regressor_head_pallas(xb, wb, bias))
    ref_big = regressor_head_ref(xb, wb, bias)
    assert jnp.allclose(out_big, ref_big, atol=5e-2, rtol=5e-2), "big-D mismatch"

    print("KERNEL_OK")
</pallas_src>

<mosaic_0001>
module attributes {stable_mosaic.version = 11 : i64} {
  func.func @_regressor_head_kernel(%arg0: memref<1x32xf32, #tpu.memory_space<vmem>>, %arg1: memref<1x32xf32, #tpu.memory_space<vmem>>, %arg2: memref<1xf32, #tpu.memory_space<smem>>, %arg3: memref<1xf32, #tpu.memory_space<smem>>) attributes {dimension_semantics = [], scalar_prefetch = 0 : i64, scratch_operands = 0 : i64, tpu.core_type = #tpu.core_type<tc>} {
    %c0 = arith.constant 0 : index
    %c0_0 = arith.constant 0 : index
    %0 = vector.load %arg0[%c0, %c0_0] : memref<1x32xf32, #tpu.memory_space<vmem>>, vector<1x32xf32>
    %c0_1 = arith.constant 0 : index
    %c0_2 = arith.constant 0 : index
    %1 = vector.load %arg1[%c0_1, %c0_2] : memref<1x32xf32, #tpu.memory_space<vmem>>, vector<1x32xf32>
    %2 = arith.mulf %0, %1 : vector<1x32xf32>
    %cst = arith.constant dense<0.000000e+00> : vector<32xf32>
    %3 = vector.multi_reduction <add>, %2, %cst [0] : vector<1x32xf32> to vector<32xf32>
    %4 = vector.shape_cast %3 : vector<32xf32> to vector<1x32xf32>
    %5 = vector.shape_cast %4 : vector<1x32xf32> to vector<1x1x32xf32>
    %cst_3 = arith.constant dense<0.000000e+00> : vector<1xf32>
    %6 = vector.multi_reduction <add>, %5, %cst_3 [1, 2] : vector<1x1x32xf32> to vector<1xf32>
    %7 = vector.shape_cast %6 : vector<1xf32> to vector<1x1x1xf32>
    %8 = vector.extract %7[0, 0, 0] : f32 from vector<1x1x1xf32>
    %c0_4 = arith.constant 0 : index
    %9 = memref.load %arg2[%c0_4] : memref<1xf32, #tpu.memory_space<smem>>
    %10 = arith.addf %8, %9 : f32
    %c0_5 = arith.constant 0 : index
    %11 = memref.load %arg3[%c0_5] : memref<1xf32, #tpu.memory_space<smem>>
    memref.store %10, %arg3[%c0_5] : memref<1xf32, #tpu.memory_space<smem>>
    return
  }
}

</mosaic_0001>

<bundles_post_ra>
// kernel: tpu_custom_call.1
= control target key start
LH: loop header
LB: loop body
LE: loop exit
PB: predicated region body
PF: predicated region fallthrough
CT: control target
= control target key end

     0   :  { %vm20_vm0 = vcmask 253952   ;;  %s94_s0 = inlined_call_operand.vmem [shape: f32[1,32], index: 0, kind: input, shape index: {}]   ;;  %s95_s1 = inlined_call_operand.vmem [shape: f32[1,32], index: 1, kind: input, shape index: {}]   ;;  %s96_s2 = inlined_call_operand.<no memory space> [shape: f32[1], index: 2, kind: input, shape index: {}]   ;;  %s97_s3 = inlined_call_operand.hbm [shape: f32[1], index: 3, kind: output, shape index: {}]  }
   0x1   :  { %v16_v0 = vld [vmem:[%s94_s0] sm:$0x1] }
   0x2   :  { %v17_v1 = vld [vmem:[%s95_s1] sm:$0x1] }
   0x3   :  { %v18_v2 = vmul.f32 %v17_v1, %v16_v0 }
   0x4   :  { %9 = vsyncpa [#allocation4], 0  ;;  %s61_s1 = smov [#allocation3]  }
   0x5   :  { %v21_v3 = vsel %vm20_vm0, %v18_v2, 0.0 }
   0x6   :  { %22 = vadd.xlane.f32.xlu0 %v21_v3 }
  0x8f   :  { %v23_v4 = vpop.xlane.xlu0 %22 }
  0x90   :  { %v24_v5 = vrot.slane %v23_v4, 4 }
  0x92   :  { %v25_v6 = vadd.f32 %v24_v5, %v23_v4 }
  0x94   :  { %v26_v7 = vrot.slane %v25_v6, 2 }
  0x96   :  { %v27_v8 = vadd.f32 %v26_v7, %v25_v6 }
  0x98   :  { %v28_v9 = vrot.slane %v27_v8, 1 }
  0x9a   :  { %v29_v10 = vadd.f32 %v28_v9, %v27_v8 }
  0x9c   :  { %48 = vpush %v29_v10 }
  0xcd   :  { %s49_s16 = spop %48 }
  0xce   :  { %s32_s18 = sadd.f32 %s49_s16, %s96_s2 }
  0xd0   :  { %34 = sst [smem:[#allocation3]] %s32_s18 }
  0xd1   :  { %42 = dma.smem_to_hbm %s61_s1, 16, %s97_s3, [#allocation4]  }
  0xd2   :  { %59 = dma.done.wait [#allocation4], 16  }
  0xd3   :  { %60 = vsyncadd [#allocation4], 4294967280 }
  0xd4   :  { %46 = sfence }
  0xd5   :  { %47 = vsyncpa [#allocation4], 1 }

</bundles_post_ra>
